<compile_context>
chip_gen: v6e
topology: v6e:2x2x1
jax: 0.10.0
libtpu: 0.0.40
codegen_flags: <defaults>
</compile_context>

<pallas_src>
import jax
import jax.numpy as jnp
from jax.experimental import pallas as pl
from jax.experimental.pallas import tpu as pltpu


def _cdiv(a, b):
    return -(-a // b)


def _round_up(a, b):
    return _cdiv(a, b) * b


def _kernel_with_other(x_ref, w_ref, b_ref, other_ref, out_ref):
    # x_ref:     (tile_r, 48)   packed activations (16 original rows x 3 features / row)
    # w_ref:     (48, 128)      kron(I_16, W^T) block-diagonal weight (resident constant)
    # b_ref:     (1, 128)       bias tiled 16x across lanes (resident constant)
    # other_ref: (tile_r, 128)  packed residual (16 original rows x 8 features / row)
    # out_ref:   (tile_r, 128)  packed output
    acc = jnp.dot(x_ref[...], w_ref[...],
                  preferred_element_type=jnp.float32,
                  precision=jax.lax.Precision.HIGHEST)
    acc = acc + b_ref[...].astype(jnp.float32) + other_ref[...].astype(jnp.float32)
    out_ref[...] = jnp.maximum(acc, 0.0).astype(out_ref.dtype)


def _kernel_folded_other(x_ref, w_ref, b_ref, out_ref):
    # Same as above but `other` has been folded into the resident bias constant.
    acc = jnp.dot(x_ref[...], w_ref[...],
                  preferred_element_type=jnp.float32,
                  precision=jax.lax.Precision.HIGHEST)
    acc = acc + b_ref[...].astype(jnp.float32)
    out_ref[...] = jnp.maximum(acc, 0.0).astype(out_ref.dtype)


def linear_add_relu(x, weight, bias, other, *, tile_rows_max=4096):
    """relu(x @ weight.T + bias + other).

    x: (..., K) ; weight: (N, K) torch layout ; bias: (N,) ; other broadcastable to (..., N).
    """
    lead = x.shape[:-1]
    K = x.shape[-1]
    N = weight.shape[0]
    assert weight.shape == (N, K) and bias.shape == (N,)
    assert 128 % N == 0, "lane-dense packing requires out_features to divide 128"
    pack = 128 // N           # original rows packed per 128-lane row (16 for N=8)
    xk = pack * K             # packed x lane width (48 for K=3)

    M = 1
    for d in lead:
        M *= d

    other = jnp.asarray(other)
    # Fast path: per-feature `other` (scalar or (N,)) folds into the resident bias
    # constant -> zero extra HBM traffic for the largest input operand.
    fold_other = (other.ndim <= 1) and (other.size in (1, N))
    bias_vec = bias.astype(jnp.float32)
    if fold_other:
        bias_vec = bias_vec + jnp.broadcast_to(
            other.astype(jnp.float32).reshape(-1), (N,))

    # Pad M only to a multiple of `pack` (<=15 rows) so the row-major reshape into the
    # lane-dense (R, xk)/(R, 128) layout is valid.  No padding to the grid: Pallas masks
    # the partial last block's writes, and the op is strictly row-wise so garbage in
    # out-of-bounds rows is harmless.
    M_pad = _round_up(max(M, 1), pack)
    R = M_pad // pack

    x2 = x.reshape(M, K)
    if M_pad != M:
        x2 = jnp.pad(x2, ((0, M_pad - M), (0, 0)))
    x_r = x2.reshape(R, xk)

    if not fold_other:
        o_full = jnp.broadcast_to(other, lead + (N,)).reshape(M, N)
        if M_pad != M:
            o_full = jnp.pad(o_full, ((0, M_pad - M), (0, 0)))
        o_r = o_full.reshape(R, 128)

    # Balanced tile selection: just enough steps to respect tile_rows_max, plus >=2 steps
    # on big problems so v7x's two TensorCores both get work.
    n_steps = max(1, _cdiv(R, tile_rows_max))
    if R >= 256:
        n_steps = max(n_steps, 2)
    tile_r = max(8, _round_up(_cdiv(R, n_steps), 8))
    grid_r = _cdiv(R, tile_r)

    # Tiny constants built once in the wrapper: block-diagonal kron(I_pack, W^T) weight
    # (24 KiB, DMA'd once via a constant index_map) and pack-tiled bias.
    w_big = jnp.kron(jnp.eye(pack, dtype=jnp.float32),
                     weight.T.astype(jnp.float32)).astype(x.dtype)
    b_big = jnp.tile(bias_vec, pack).reshape(1, pack * N)

    common = dict(
        out_shape=jax.ShapeDtypeStruct((R, 128), x.dtype),
        grid=(grid_r,),
        out_specs=pl.BlockSpec((tile_r, 128), lambda i: (i, 0)),
        compiler_params=pltpu.CompilerParams(
            dimension_semantics=("parallel",),
        ),
    )

    if fold_other:
        out_r = pl.pallas_call(
            _kernel_folded_other,
            in_specs=[
                pl.BlockSpec((tile_r, xk), lambda i: (i, 0)),  # packed x, tiled over rows
                pl.BlockSpec((xk, 128), lambda i: (0, 0)),     # resident weight
                pl.BlockSpec((1, 128), lambda i: (0, 0)),      # resident bias(+other)
            ],
            **common,
        )(x_r, w_big, b_big)
    else:
        out_r = pl.pallas_call(
            _kernel_with_other,
            in_specs=[
                pl.BlockSpec((tile_r, xk), lambda i: (i, 0)),   # packed x
                pl.BlockSpec((xk, 128), lambda i: (0, 0)),      # resident weight
                pl.BlockSpec((1, 128), lambda i: (0, 0)),       # resident bias
                pl.BlockSpec((tile_r, 128), lambda i: (i, 0)),  # packed other
            ],
            **common,
        )(x_r, w_big, b_big, o_r)

    out = out_r.reshape(M_pad, N)
    if M_pad != M:
        out = out[:M]
    return out.reshape(lead + (N,))


def _reference(x, weight, bias, other):
    return jnp.maximum(jnp.einsum("...k,nk->...n", x, weight) + bias + other, 0.0)


if __name__ == "__main__":
    key = jax.random.PRNGKey(0)
    k_w, k_b, k_x1, k_o1, k_x2, k_o2, k_x3, k_o3 = jax.random.split(key, 8)

    IN_F, OUT_F = 3, 8

    # nn.Linear(3, 8) parameters (torch layout: weight (8, 3), bias (8,))
    weight = jax.random.normal(k_w, (OUT_F, IN_F), dtype=jnp.float32) * 0.1
    bias = jax.random.normal(k_b, (OUT_F,), dtype=jnp.float32) * 0.1

    fn = jax.jit(linear_add_relu)

    # Check 1: channels-last reading of the spec's (1, 3, 64, 64) input -> (1, 64, 64, 3).
    # R=256 packed rows -> grid of 2 balanced tiles (exercises megacore sharding path).
    x1 = jax.random.normal(k_x1, (1, 64, 64, IN_F), dtype=jnp.float32)
    other1 = jax.random.normal(k_o1, (1, 64, 64, OUT_F), dtype=jnp.float32)
    out1 = jax.block_until_ready(fn(x1, weight, bias, other1))
    assert out1.shape == (1, 64, 64, OUT_F)
    assert jnp.allclose(out1, _reference(x1, weight, bias, other1), atol=1e-5, rtol=1e-5), \
        "mismatch vs reference (check 1)"

    # Check 2: ragged M (2*33*17 = 1122 rows, not a multiple of 16) with a full `other`
    # -> tiny pack-pad + partial last block masked by Pallas.
    x2 = jax.random.normal(k_x2, (2, 33, 17, IN_F), dtype=jnp.float32)
    other2 = jax.random.normal(k_o2, (2, 33, 17, OUT_F), dtype=jnp.float32)
    out2 = jax.block_until_ready(fn(x2, weight, bias, other2))
    assert out2.shape == (2, 33, 17, OUT_F)
    assert jnp.allclose(out2, _reference(x2, weight, bias, other2), atol=1e-5, rtol=1e-5), \
        "mismatch vs reference (check 2)"

    # Check 3: per-feature broadcast `other` of shape (8,) -> folded into the resident
    # bias constant (no HBM materialization of the broadcast).
    x3 = jax.random.normal(k_x3, (2, 16, 16, IN_F), dtype=jnp.float32)
    other3 = jax.random.normal(k_o3, (OUT_F,), dtype=jnp.float32)
    out3 = jax.block_until_ready(fn(x3, weight, bias, other3))
    assert out3.shape == (2, 16, 16, OUT_F)
    assert jnp.allclose(out3, _reference(x3, weight, bias, other3), atol=1e-5, rtol=1e-5), \
        "mismatch vs reference (check 3)"

    print("KERNEL_OK")
</pallas_src>

<mosaic_0001>
module attributes {stable_mosaic.version = 11 : i64} {
  func.func @_kernel_with_other(%arg0: i32, %arg1: memref<128x48xf32, #tpu.memory_space<vmem>>, %arg2: memref<48x128xf32, #tpu.memory_space<vmem>>, %arg3: memref<1x128xf32, #tpu.memory_space<vmem>>, %arg4: memref<128x128xf32, #tpu.memory_space<vmem>>, %arg5: memref<128x128xf32, #tpu.memory_space<vmem>>) attributes {dimension_semantics = [#tpu.dimension_semantics<parallel>], iteration_bounds = array<i64: 2>, scalar_prefetch = 0 : i64, scratch_operands = 0 : i64, tpu.core_type = #tpu.core_type<tc>, window_params = [{transform_indices = @transform_0, window_bounds = array<i64: 128, 48>}, {pipeline_mode = #tpu.pipeline_mode<synchronous>, transform_indices = @transform_1, window_bounds = array<i64: 48, 128>}, {pipeline_mode = #tpu.pipeline_mode<synchronous>, transform_indices = @transform_2, window_bounds = array<i64: 1, 128>}, {transform_indices = @transform_3, window_bounds = array<i64: 128, 128>}, {transform_indices = @transform_4, window_bounds = array<i64: 128, 128>}]} {
    %c0 = arith.constant 0 : index
    %c0_0 = arith.constant 0 : index
    %0 = vector.load %arg1[%c0, %c0_0] : memref<128x48xf32, #tpu.memory_space<vmem>>, vector<128x48xf32>
    %c0_1 = arith.constant 0 : index
    %c0_2 = arith.constant 0 : index
    %1 = vector.load %arg2[%c0_1, %c0_2] : memref<48x128xf32, #tpu.memory_space<vmem>>, vector<48x128xf32>
    %cst = arith.constant dense<0.000000e+00> : vector<128x128xf32>
    %2 = tpu.matmul %0, %1, %cst {dimension_numbers = #tpu.dot_dimension_numbers<[1], [0], [0], [1], [0, 0, 1, 1], [], []>, precision = #tpu.contract_precision<fp32>} : vector<128x48xf32>, vector<48x128xf32>, vector<128x128xf32> -> vector<128x128xf32>
    %c0_3 = arith.constant 0 : index
    %c0_4 = arith.constant 0 : index
    %3 = vector.load %arg3[%c0_3, %c0_4] : memref<1x128xf32, #tpu.memory_space<vmem>>, vector<1x128xf32>
    %4 = vector.broadcast %3 : vector<1x128xf32> to vector<128x128xf32>
    %5 = arith.addf %2, %4 : vector<128x128xf32>
    %c0_5 = arith.constant 0 : index
    %c0_6 = arith.constant 0 : index
    %6 = vector.load %arg4[%c0_5, %c0_6] : memref<128x128xf32, #tpu.memory_space<vmem>>, vector<128x128xf32>
    %7 = arith.addf %5, %6 : vector<128x128xf32>
    %cst_7 = arith.constant 0.000000e+00 : f32
    %8 = vector.broadcast %cst_7 : f32 to vector<128x128xf32>
    %9 = arith.maximumf %7, %8 : vector<128x128xf32>
    %c0_8 = arith.constant 0 : index
    %c0_9 = arith.constant 0 : index
    %10 = vector.load %arg5[%c0_8, %c0_9] : memref<128x128xf32, #tpu.memory_space<vmem>>, vector<128x128xf32>
    tpu.vector_store %arg5[%c0_8, %c0_9], %9 {strides = array<i32>} : memref<128x128xf32, #tpu.memory_space<vmem>>, vector<128x128xf32>,
    return
  }
  func.func @transform_0(%arg0: i32) -> (i32, i32) {
    %c0_i32 = arith.constant 0 : i32
    %c0_i32_0 = arith.constant 0 : i32
    return %arg0, %c0_i32 : i32, i32
  }
  func.func @transform_1(%arg0: i32) -> (i32, i32) {
    %c0_i32 = arith.constant 0 : i32
    %c0_i32_0 = arith.constant 0 : i32
    %c0_i32_1 = arith.constant 0 : i32
    return %c0_i32, %c0_i32_0 : i32, i32
  }
  func.func @transform_2(%arg0: i32) -> (i32, i32) {
    %c0_i32 = arith.constant 0 : i32
    %c0_i32_0 = arith.constant 0 : i32
    %c0_i32_1 = arith.constant 0 : i32
    return %c0_i32, %c0_i32_0 : i32, i32
  }
  func.func @transform_3(%arg0: i32) -> (i32, i32) {
    %c0_i32 = arith.constant 0 : i32
    %c0_i32_0 = arith.constant 0 : i32
    return %arg0, %c0_i32 : i32, i32
  }
  func.func @transform_4(%arg0: i32) -> (i32, i32) {
    %c0_i32 = arith.constant 0 : i32
    %c0_i32_0 = arith.constant 0 : i32
    return %arg0, %c0_i32 : i32, i32
  }
}

</mosaic_0001>

<bundles_post_ra>
// kernel: tile.8
= control target key start
LH: loop header
LB: loop body
LE: loop exit
PB: predicated region body
PF: predicated region fallthrough
CT: control target
= control target key end

     0   :  { %s28_s0 = inlined_call_operand.vmem [shape: f32[8], index: 0, kind: input, shape index: {}]   ;;  %s29_s1 = inlined_call_operand.vmem [shape: f32[16,8], index: 1, kind: output, shape index: {}]  }
   0x1   :  { %v4_v0 = vld [vmem:[%s28_s0] ss:$0 sm:$0xff] }
   0x2   :  { %5 = vst [vmem:[%s29_s1] sm:$0xff] %v4_v0  ;;  %8 = vst [vmem:[%s29_s1 + $0x8] sm:$0xff] %v4_v0 }

// kernel: tile.9
= control target key start
LH: loop header
LB: loop body
LE: loop exit
PB: predicated region body
PF: predicated region fallthrough
CT: control target
= control target key end

     0   :  { %s133_s10 = smov 120   ;;  %s134_s11 = smov 104   ;;  %vm3_vm0 = vcmask 64512   ;;  %vm9_vm1 = vcmask 1048512   ;;  %vm15_vm2 = vcmask 982912   ;;  %vm21_vm3 = vcmask 917312   ;;  %s209_s0 = inlined_call_operand.vmem [shape: f32[16,8], index: 0, kind: input, shape index: {}]   ;;  %s210_s1 = inlined_call_operand.vmem [shape: f32[1,128], index: 1, kind: output, shape index: {}]  }
   0x1   :  { %v103_v0 = vld [vmem:[%s209_s0 + $0xf] sm:$0x1]   ;;  %v105_v1 = vld [vmem:[%s209_s0 + $0xd] sm:$0x1]   ;;  %v104_v2 = vld [vmem:[%s209_s0 + $0xe] sm:$0x1]  }
   0x2   :  { %7 = vrot.lane.b32.xlu0 %v103_v0, %s133_s10  ;;  %19 = vrot.lane.b32.xlu1 %v105_v1, %s134_s11  ;;  %v106_v3 = vld [vmem:[%s209_s0 + $0xc] sm:$0x1]   ;;  %s135_s16 = smov 112   ;;  %s136_s17 = smov 96   ;;  %v107_v4 = vld [vmem:[%s209_s0 + $0xb] sm:$0x1]  }
   0x3   :  { %v108_v5 = vld [vmem:[%s209_s0 + $0xa] sm:$0x1]   ;;  %v2_v6 = vld [vmem:[%s209_s0] sm:$0x1]   ;;  %s137_s24 = smov 88   ;;  %s138_s25 = smov 80  }
   0x4   :  { %4 = vst.msk [vmem:[#allocation0] sm:$0x1] %vm3_vm0, %v2_v6   ;;  %v109_v7 = vld [vmem:[%s209_s0 + $0x9] sm:$0x1]   ;;  %v110_v8 = vld [vmem:[%s209_s0 + $0x8] sm:$0x1]  }
   0x5   :  { %s139_s30 = smov 72   ;;  %s140_s2 = smov 64   ;;  %v111_v9 = vld [vmem:[%s209_s0 + $0x7] sm:$0x1]   ;;  %v112_v10 = vld [vmem:[%s209_s0 + $0x6] sm:$0x1]  }
   0x6   :  { %13 = vrot.lane.b32.xlu0 %v104_v2, %s135_s16  ;;  %25 = vrot.lane.b32.xlu1 %v106_v3, %s136_s17  ;;  %s141_s7 = smov 56   ;;  %s142_s8 = smov 48   ;;  %v113_v11 = vld [vmem:[%s209_s0 + $0x5] sm:$0x1]   ;;  %v114_v12 = vld [vmem:[%s209_s0 + $0x4] sm:$0x1]  }
   0x7   :  { %s143_s13 = smov 40   ;;  %s144_s14 = smov 32   ;;  %v115_v13 = vld [vmem:[%s209_s0 + $0x3] sm:$0x1]   ;;  %v116_v14 = vld [vmem:[%s209_s0 + $0x2] sm:$0x1]  }
   0x8   :  { %s145_s19 = smov 24   ;;  %s146_s20 = smov 16   ;;  %v117_v15 = vld [vmem:[%s209_s0 + $0x1] sm:$0x1]   ;;  %vm27_vm4 = vcmask 851712   ;;  %vm33_vm5 = vcmask 786112  }
   0x9   :  { %s147_s0 = smov 8   ;;  %vm39_vm6 = vcmask 720512   ;;  %vm45_vm7 = vcmask 654912   ;;  %vm51_vm8 = vcmask 589312   ;;  %vm57_vm9 = vcmask 523712  }
   0xa   :  { %31 = vrot.lane.b32.xlu0 %v107_v4, %s137_s24  ;;  %37 = vrot.lane.b32.xlu1 %v108_v5, %s138_s25  ;;  %vm63_vm10 = vcmask 458112   ;;  %vm69_vm11 = vcmask 392512   ;;  %vm75_vm12 = vcmask 326912   ;;  %vm81_vm13 = vcmask 261312  }
   0xb   :  { %vm87_vm14 = vcmask 195712   ;;  %vm93_vm15 = vcmask 130112  }
   0xe   :  { %43 = vrot.lane.b32.xlu0 %v109_v7, %s139_s30  ;;  %49 = vrot.lane.b32.xlu1 %v110_v8, %s140_s2 }
  0x12   :  { %55 = vrot.lane.b32.xlu0 %v111_v9, %s141_s7  ;;  %61 = vrot.lane.b32.xlu1 %v112_v10, %s142_s8 }
  0x16   :  { %67 = vrot.lane.b32.xlu0 %v113_v11, %s143_s13  ;;  %73 = vrot.lane.b32.xlu1 %v114_v12, %s144_s14 }
  0x1a   :  { %79 = vrot.lane.b32.xlu0 %v115_v13, %s145_s19  ;;  %85 = vrot.lane.b32.xlu1 %v116_v14, %s146_s20 }
  0x1e   :  { %91 = vrot.lane.b32.xlu0 %v117_v15, %s147_s0 }
  0x74   :  { %v8_v16 = vpop.permute.xlu0 %7   ;;  %v20_v17 = vpop.permute.xlu1 %19  }
  0x75   :  { %10 = vst.msk [vmem:[#allocation0] sm:$0x1] %vm9_vm1, %v8_v16  }
  0x78   :  { %v14_v18 = vpop.permute.xlu0 %13   ;;  %v26_v19 = vpop.permute.xlu1 %25  }
  0x79   :  { %16 = vst.msk [vmem:[#allocation0] sm:$0x1] %vm15_vm2, %v14_v18  }
  0x7a   :  { %22 = vst.msk [vmem:[#allocation0] sm:$0x1] %vm21_vm3, %v20_v17  }
  0x7b   :  { %28 = vst.msk [vmem:[#allocation0] sm:$0x1] %vm27_vm4, %v26_v19  }
  0x7c   :  { %v32_v20 = vpop.permute.xlu0 %31   ;;  %v38_v21 = vpop.permute.xlu1 %37  }
  0x7d   :  { %34 = vst.msk [vmem:[#allocation0] sm:$0x1] %vm33_vm5, %v32_v20  }
  0x7e   :  { %40 = vst.msk [vmem:[#allocation0] sm:$0x1] %vm39_vm6, %v38_v21  }
  0x80   :  { %v44_v22 = vpop.permute.xlu0 %43   ;;  %v50_v23 = vpop.permute.xlu1 %49  }
  0x81   :  { %46 = vst.msk [vmem:[#allocation0] sm:$0x1] %vm45_vm7, %v44_v22  }
  0x82   :  { %52 = vst.msk [vmem:[#allocation0] sm:$0x1] %vm51_vm8, %v50_v23  }
  0x84   :  { %v56_v24 = vpop.permute.xlu0 %55   ;;  %v62_v25 = vpop.permute.xlu1 %61  }
  0x85   :  { %58 = vst.msk [vmem:[#allocation0] sm:$0x1] %vm57_vm9, %v56_v24  }
  0x86   :  { %64 = vst.msk [vmem:[#allocation0] sm:$0x1] %vm63_vm10, %v62_v25  }
  0x88   :  { %v68_v26 = vpop.permute.xlu0 %67   ;;  %v74_v27 = vpop.permute.xlu1 %73  }
  0x89   :  { %70 = vst.msk [vmem:[#allocation0] sm:$0x1] %vm69_vm11, %v68_v26  }
  0x8a   :  { %76 = vst.msk [vmem:[#allocation0] sm:$0x1] %vm75_vm12, %v74_v27  }
  0x8c   :  { %v80_v28 = vpop.permute.xlu0 %79   ;;  %v86_v29 = vpop.permute.xlu1 %85  }
  0x8d   :  { %82 = vst.msk [vmem:[#allocation0] sm:$0x1] %vm81_vm13, %v80_v28  }
  0x8e   :  { %88 = vst.msk [vmem:[#allocation0] sm:$0x1] %vm87_vm14, %v86_v29  }
  0x90   :  { %v92_v30 = vpop.permute.xlu0 %91  }
  0x91   :  { %94 = vst.msk [vmem:[#allocation0] sm:$0x1] %vm93_vm15, %v92_v30  }
  0x98   :  { %v99_v31 = vld [vmem:[#allocation0] sm:$0x1] }
  0x99   :  { %102 = vst [vmem:[%s210_s1] sm:$0x1] %v99_v31 }

// kernel: linear_add_relu.1
= control target key start
LH: loop header
LB: loop body
LE: loop exit
PB: predicated region body
PF: predicated region fallthrough
CT: control target
= control target key end

     0   :  { %s1992_s15 = smov 0   ;;  %s2631_s0 = inlined_call_operand.vmem [shape: f32[256,48], index: 0, kind: input, shape index: {}]   ;;  %s2632_s1 = inlined_call_operand.vmem [shape: f32[48,128], index: 1, kind: input, shape index: {}]   ;;  %s2633_s2 = inlined_call_operand.vmem [shape: f32[1,128], index: 2, kind: input, shape index: {}]   ;;  %s2634_s3 = inlined_call_operand.vmem [shape: f32[256,128], index: 3, kind: input, shape index: {}]   ;;  %s2635_s4 = inlined_call_operand.vmem [shape: f32[256,128], index: 4, kind: output, shape index: {}]  }
   0x1 LB: > { %s1589_s16 = sadd.s32 4294967295, %s1965_s15   ;;  %p1593_p0 = scmp.ge.s32.totalorder %s1965_s15, 1  ;;  %s1965_s15 = sphi %s1992_s15, %s14_s15  }
   0x2   : > { %p174_p1 = scmp.lt.s32.totalorder %s1965_s15, 3 }
   0x4   : > { %p175_p2 = pnand %p1593_p0, %p174_p1 }
   0x6   : > { %178 = sbr.rel (%p175_p2) target bundleno = 328 (0x148), region = 36 }
   0xb   : > { %v244_v0 = vld [vmem:[%s2632_s1 + $0x28] sm:$0xff]  ;;  %v243_v1 = vld [vmem:[%s2632_s1 + $0x20] sm:$0xff]  ;;  %v242_v2 = vld [vmem:[%s2632_s1 + $0x18] sm:$0xff]  ;;  %s1594_s23 = sshll.u32 %s1589_s16, 4  ;;  %vm252_vm0 = vcmask 392192  }
   0xc   : > { %v2009_v3 = vand.u32 4294901760, %v244_v0  ;;  %v2011_v4 = vand.u32 4294901760, %v243_v1  ;;  %v2013_v5 = vand.u32 4294901760, %v242_v2  ;;  %v241_v6 = vld [vmem:[%s2632_s1 + $0x10] sm:$0xff]  ;;  %v240_v7 = vld [vmem:[%s2632_s1 + $0x8] sm:$0xff]  ;;  %v239_v8 = vld [vmem:[%s2632_s1] sm:$0xff] }
   0xd   : > { %v2024_v9 = vand.u32 4294901760, %v241_v6  ;;  %v2026_v10 = vand.u32 4294901760, %v240_v7  ;;  %v2028_v11 = vand.u32 4294901760, %v239_v8  ;;  %p206_p3 = scmp.lt.s32.totalorder %s1594_s23, 31 }
   0xe   : > { %1735 = vmatprep.subr.mxu0 %v2009_v3  ;;  %v2032_v12 = vsub.f32 %v244_v0, %v2009_v3  ;;  %v2035_v13 = vsub.f32 %v243_v1, %v2011_v4  ;;  %v2038_v14 = vsub.f32 %v242_v2, %v2013_v5 }
   0xf   : > { %1736 = vmatpush3.msra.mxu0 %v2009_v3  ;;  %v2042_v15 = vsub.f32 %v241_v6, %v2024_v9  ;;  %s2661_s23 = smov (!%p206_p3, %s1594_s23), 31  ;;  %v2045_v16 = vsub.f32 %v240_v7, %v2026_v10  ;;  %v2048_v17 = vsub.f32 %v239_v8, %v2028_v11 }
  0x10   : > { %1737 = vmatprep.subr.mxu0 %v2011_v4  ;;  %v2052_v18 = vand.u32 4294901760, %v2032_v12  ;;  %v2055_v19 = vand.u32 4294901760, %v2035_v13  ;;  %v2058_v20 = vand.u32 4294901760, %v2038_v14  ;;  %s2064_s30 = sshll.u32 %s2661_s23, 3 }
  0x11   : > { %1738 = vmatpush3.msra.mxu0 %v2011_v4  ;;  %v2062_v21 = vand.u32 4294901760, %v2042_v15  ;;  %v2067_v22 = vand.u32 4294901760, %v2045_v16  ;;  %v2070_v23 = vand.u32 4294901760, %v2048_v17  ;;  %s2083_s7 = scalar_lea.vmem %s2631_s0, %s2064_s30  ;;  %s2532_s12 = scalar_lea.vmem %s2634_s3, %s2064_s30 }
  0x12   : > { %v556_v24 = vsub.f32 %v2032_v12, %v2052_v18  ;;  %1739 = vmatprep.subr.mxu0 %v2013_v5  ;;  %v563_v25 = vsub.f32 %v2035_v13, %v2055_v19  ;;  %v570_v26 = vsub.f32 %v2038_v14, %v2058_v20  ;;  %v223_v28 = vld [vmem:[%s2083_s7] sm:$0xff]  ;;  %v224_v30 = vld [vmem:[%s2083_s7 + $0x8] sm:$0xff]  ;;  %v225_v32 = vld [vmem:[%s2083_s7 + $0x10] sm:$0xff]  ;;  %s2556_s16 = scalar_lea.vmem %s2635_s4, %s2064_s30 }
  0x13   : > { %1740 = vmatpush3.msra.mxu0 %v2013_v5  ;;  %v577_v27 = vsub.f32 %v2042_v15, %v2062_v21  ;;  %v584_v29 = vsub.f32 %v2045_v16, %v2067_v22  ;;  %v591_v31 = vsub.f32 %v2048_v17, %v2070_v23  ;;  %v254_v36 = vsel %vm252_vm0, %v223_v28, 0  ;;  %v226_v37 = vld [vmem:[%s2083_s7 + $0x18] sm:$0xff]  ;;  %v227_v38 = vld [vmem:[%s2083_s7 + $0x20] sm:$0xff]  ;;  %v228_v43 = vld [vmem:[%s2083_s7 + $0x28] sm:$0xff] }
  0x14   : > { %v557_v33 = vand.u32 4294901760, %v556_v24  ;;  %v564_v34 = vand.u32 4294901760, %v563_v25  ;;  %1741 = vmatprep.subr.mxu0 %v2024_v9  ;;  %v571_v35 = vand.u32 4294901760, %v570_v26  ;;  %v2100_v40 = vand.u32 4294901760, %v254_v36  ;;  %v229_v44 = vld [vmem:[%s2083_s7 + $0x30] sm:$0xff]  ;;  %v230_v53 = vld [vmem:[%s2083_s7 + $0x38] sm:$0xff] }
  0x15   : > { %1742 = vmatpush3.msra.mxu0 %v2024_v9  ;;  %v578_v39 = vand.u32 4294901760, %v577_v27  ;;  %v585_v41 = vand.u32 4294901760, %v584_v29  ;;  %v257_v42 = vsel %vm252_vm0, %v224_v30, 0  ;;  %v2108_v46 = vand.u32 4294901760, %v591_v31  ;;  %v231_v28 = vld [vmem:[%s2083_s7 + $0x40] sm:$0xff] }
  0x16   : > { %1771 = vmatprep.subr.mxu1 %v557_v33  ;;  %1743 = vmatprep.subr.mxu0 %v2026_v10  ;;  %v2106_v45 = vand.u32 4294901760, %v257_v42  ;;  %v260_v47 = vsel %vm252_vm0, %v225_v32, 0  ;;  %v263_v48 = vsel %vm252_vm0, %v226_v37, 0  ;;  %v2114_v49 = vsub.f32 %v254_v36, %v2100_v40  ;;  %v232_v37 = vld [vmem:[%s2083_s7 + $0x48] sm:$0xff] }
  0x17   : > { %1772 = vmatpush3.msra.mxu1 %v557_v33  ;;  %1744 = vmatpush3.msra.mxu0 %v2026_v10  ;;  %v2116_v50 = vand.u32 4294901760, %v260_v47  ;;  %v2118_v51 = vand.u32 4294901760, %v263_v48  ;;  %v266_v52 = vsel %vm252_vm0, %v227_v38, 0  ;;  %v269_v56 = vsel %vm252_vm0, %v228_v43, 0  ;;  %v233_v38 = vld [vmem:[%s2083_s7 + $0x50] sm:$0xff] }
  0x18   : > { %1773 = vmatprep.subr.mxu1 %v564_v34  ;;  %1745 = vmatprep.subr.mxu0 %v2028_v11  ;;  %v2124_v54 = vsub.f32 %v257_v42, %v2106_v45  ;;  %v2126_v55 = vand.u32 4294901760, %v266_v52  ;;  %v272_v57 = vsel %vm252_vm0, %v229_v44, 0  ;;  %v374_v58 = vand.u32 4294901760, %v2114_v49 }
  0x19   : > { %1774 = vmatpush3.msra.mxu1 %v564_v34  ;;  %1746 = vmatpush3.msra.mxu0 %v2028_v11  ;;  %v2133_v59 = vsub.f32 %v260_v47, %v2116_v50  ;;  %v2136_v60 = vsub.f32 %v263_v48, %v2118_v51  ;;  %v2138_v61 = vand.u32 4294901760, %v269_v56  ;;  %v2145_v0 = vand.u32 4294901760, %v272_v57 }
  0x1a   : > { %1775 = vmatprep.subr.mxu1 %v571_v35  ;;  %v384_v62 = vand.u32 4294901760, %v2124_v54  ;;  %1807 = vmatprep.subr.mxu0 %v2032_v12  ;;  %v2143_v63 = vsub.f32 %v266_v52, %v2126_v55  ;;  %v275_v1 = vsel %vm252_vm0, %v230_v53, 0  ;;  %v375_v2 = vsub.f32 %v2114_v49, %v374_v58 }
  0x1b   : > { %1776 = vmatpush3.msra.mxu1 %v571_v35  ;;  %1783 = vmatprep.mubr.f32.mxu1 %v2100_v40  ;;  %v394_v6 = vand.u32 4294901760, %v2133_v59  ;;  %v404_v7 = vand.u32 4294901760, %v2136_v60  ;;  %v2155_v8 = vsub.f32 %v269_v56, %v2138_v61  ;;  %v2162_v26 = vsub.f32 %v272_v57, %v2145_v0  ;;  %v236_v56 = vld [vmem:[%s2083_s7 + $0x68] sm:$0xff] }
  0x1c   : > { %1777 = vmatprep.subr.mxu1 %v578_v39  ;;  %v385_v24 = vsub.f32 %v2124_v54, %v384_v62  ;;  %v414_v25 = vand.u32 4294901760, %v2143_v63  ;;  %v2164_v27 = vand.u32 4294901760, %v275_v1  ;;  %v376_v29 = vand.u32 4294901760, %v375_v2 }
  0x1d   : > { %1778 = vmatpush3.msra.mxu1 %v578_v39  ;;  %v395_v30 = vsub.f32 %v2133_v59, %v394_v6  ;;  %v405_v31 = vsub.f32 %v2136_v60, %v404_v7  ;;  %v2639_v32 = vand.u32 4294901760, %v2155_v8  ;;  %v2638_v35 = vand.u32 4294901760, %v2162_v26  ;;  %v234_v39 = vld [vmem:[%s2083_s7 + $0x58] sm:$0xff] }
  0x1e   : > { %1779 = vmatprep.subr.mxu1 %v585_v41  ;;  %v386_v33 = vand.u32 4294901760, %v385_v24  ;;  %v415_v34 = vsub.f32 %v2143_v63, %v414_v25  ;;  %v2179_v36 = vsub.f32 %v275_v1, %v2164_v27  ;;  %1747 = vmatprep.mubr.f32.mxu0 %v376_v29  ;;  %v278_v44 = vsel %vm252_vm0, %v231_v28, 0 }
  0x1f   : > { %1780 = vmatpush3.msra.mxu1 %v585_v41  ;;  %v396_v42 = vand.u32 4294901760, %v395_v30  ;;  %v425_v43 = vsub.f32 %v2155_v8, %v2639_v32  ;;  %v406_v47 = vand.u32 4294901760, %v405_v31  ;;  %v435_v48 = vsub.f32 %v2162_v26, %v2638_v35  ;;  %v235_v41 = vld [vmem:[%s2083_s7 + $0x60] sm:$0xff]  ;;  %v237_v30 = vld [vmem:[%s2083_s7 + $0x70] sm:$0xff] }
  0x20   : > { %1748 = vmatmul.mubr.f32.vlgmr.msra.gmra.mxu0 %v386_v33  ;;  %1781 = vmatprep.subr.mxu1 %v2108_v46  ;;  %v2636_v52 = vand.u32 4294901760, %v2179_v36  ;;  %v2193_v53 = vand.u32 4294901760, %v278_v44  ;;  %v416_v57 = vand.u32 4294901760, %v415_v34  ;;  %v281_v1 = vsel %vm252_vm0, %v232_v37, 0 }
  0x21   : > { %1782 = vmatpush3.msra.mxu1 %v2108_v46  ;;  %1808 = vmatpush3.msra.mxu0 %v2032_v12  ;;  %v284_v2 = vsel %vm252_vm0, %v233_v38, 0  ;;  %v287_v24 = vsel %vm252_vm0, %v234_v39, 0  ;;  %v426_v28 = vand.u32 4294901760, %v425_v43  ;;  %v2209_v12 = vand.u32 4294901760, %v281_v1 }
  0x22   : > { %1750 = vmatprep.mubr.f32.mxu0 %v396_v42  ;;  %1784 = vmatmul.mubr.f32.vlgmr.msra.gmra.mxu1 %v2106_v45  ;;  %v445_v29 = vsub.f32 %v2179_v36, %v2636_v52  ;;  %v2207_v46 = vsub.f32 %v278_v44, %v2193_v53  ;;  %v2214_v31 = vand.u32 4294901760, %v284_v2  ;;  %v2216_v33 = vand.u32 4294901760, %v287_v24  ;;  %v238_v44 = vld [vmem:[%s2083_s7 + $0x78] sm:$0xff] }
  0x23   : > { %1843 = vmatprep.subr.mxu1 %v2009_v3  ;;  %1786 = vmatprep.mubr.f32.mxu1 %v2116_v50  ;;  %v290_v34 = vsel %vm252_vm0, %v235_v41, 0  ;;  %v293_v37 = vsel %vm252_vm0, %v236_v56, 0  ;;  %v436_v38 = vand.u32 4294901760, %v435_v48  ;;  %v2223_v42 = vsub.f32 %v281_v1, %v2209_v12 }
  0x24   : > { %1751 = vmatmul.mubr.f32.gmra.mxu0 %v406_v47  ;;  %1844 = vmatpush3.msra.mxu1 %v2009_v3  ;;  %v2637_v39 = vand.u32 4294901760, %v2207_v46  ;;  %v2225_v43 = vand.u32 4294901760, %v290_v34  ;;  %v2230_v52 = vsub.f32 %v284_v2, %v2214_v31  ;;  %v2233_v41 = vsub.f32 %v287_v24, %v2216_v33 }
  0x25   : > { %1753 = vmatprep.mubr.f32.mxu0 %v416_v57  ;;  %1809 = vmatprep.subr.mxu0 %v2035_v13  ;;  %v2235_v47 = vand.u32 4294901760, %v293_v37  ;;  %v296_v48 = vsel %vm252_vm0, %v237_v30, 0  ;;  %v2641_v57 = vand.u32 4294901760, %v2223_v42  ;;  %v446_v24 = vand.u32 4294901760, %v445_v29 }
  0x26   : > { %1787 = vmatmul.mubr.f32.gmra.mxu1 %v2118_v51  ;;  %1810 = vmatpush3.msra.mxu0 %v2035_v13  ;;  %v455_v56 = vsub.f32 %v2207_v46, %v2637_v39  ;;  %v2245_v1 = vsub.f32 %v290_v34, %v2225_v43  ;;  %v2247_v2 = vand.u32 4294901760, %v296_v48  ;;  %v2640_v30 = vand.u32 4294901760, %v2230_v52 }
  0x27   : > { %1845 = vmatprep.subr.mxu1 %v2011_v4  ;;  %1789 = vmatprep.mubr.f32.mxu1 %v2126_v55  ;;  %v299_v13 = vsel %vm252_vm0, %v238_v44, 0  ;;  %v465_v34 = vsub.f32 %v2223_v42, %v2641_v57  ;;  %v484_v35 = vand.u32 4294901760, %v2233_v41  ;;  %v2259_v32 = vsub.f32 %v293_v37, %v2235_v47 }
  0x28   : > { %1754 = vmatmul.mubr.f32.gmra.mxu0 %v426_v28  ;;  %1846 = vmatpush3.msra.mxu1 %v2011_v4  ;;  %v456_v39 = vand.u32 4294901760, %v455_v56  ;;  %v475_v29 = vsub.f32 %v2230_v52, %v2640_v30  ;;  %v494_v28 = vand.u32 4294901760, %v2245_v1  ;;  %v2267_v44 = vsub.f32 %v296_v48, %v2247_v2 }
  0x29   : > { %1756 = vmatprep.mubr.f32.mxu0 %v436_v38  ;;  %1811 = vmatprep.subr.mxu0 %v2038_v14  ;;  %v2269_v56 = vand.u32 4294901760, %v299_v13  ;;  %v466_v37 = vand.u32 4294901760, %v465_v34  ;;  %v485_v38 = vsub.f32 %v2233_v41, %v484_v35  ;;  %v504_v48 = vand.u32 4294901760, %v2259_v32 }
  0x2a   : > { %1790 = vmatmul.mubr.f32.gmra.mxu1 %v2138_v61  ;;  %1812 = vmatpush3.msra.mxu0 %v2038_v14  ;;  %v476_v14 = vand.u32 4294901760, %v475_v29  ;;  %v514_v57 = vand.u32 4294901760, %v2267_v44 }
  0x2b   : > { %1792 = vmatprep.mubr.f32.mxu1 %v2145_v0  ;;  %1847 = vmatprep.subr.mxu1 %v2013_v5  ;;  %v2281_v30 = vsub.f32 %v299_v13, %v2269_v56  ;;  %v486_v13 = vand.u32 4294901760, %v485_v38 }
  0x2c   : > { %1757 = vmatmul.mubr.f32.gmra.mxu0 %v446_v24  ;;  %1848 = vmatpush3.msra.mxu1 %v2013_v5  ;;  %v495_v24 = vsub.f32 %v2245_v1, %v494_v28 }
  0x2d   : > { %1759 = vmatprep.mubr.f32.mxu0 %v456_v39  ;;  %1813 = vmatprep.subr.mxu0 %v2042_v15  ;;  %v505_v39 = vsub.f32 %v2259_v32, %v504_v48  ;;  %v524_v34 = vand.u32 4294901760, %v2281_v30 }
  0x2e   : > { %1793 = vmatmul.mubr.f32.gmra.mxu1 %v2164_v27  ;;  %1814 = vmatpush3.msra.mxu0 %v2042_v15  ;;  %v496_v29 = vand.u32 4294901760, %v495_v24  ;;  %v515_v15 = vsub.f32 %v2267_v44, %v514_v57 }
  0x2f   : > { %1795 = vmatprep.mubr.f32.mxu1 %v2193_v53  ;;  %1849 = vmatprep.subr.mxu1 %v2024_v9  ;;  %v525_v38 = vsub.f32 %v2281_v30, %v524_v34 }
  0x30   : > { %1760 = vmatmul.mubr.f32.gmra.mxu0 %v466_v37  ;;  %1850 = vmatpush3.msra.mxu1 %v2024_v9  ;;  %v506_v37 = vand.u32 4294901760, %v505_v39 }
  0x31   : > { %1762 = vmatprep.mubr.f32.mxu0 %v476_v14  ;;  %1815 = vmatprep.subr.mxu0 %v2045_v16  ;;  %v516_v14 = vand.u32 4294901760, %v515_v15 }
  0x32   : > { %1796 = vmatmul.mubr.f32.gmra.mxu1 %v2209_v12  ;;  %1816 = vmatpush3.msra.mxu0 %v2045_v16  ;;  %v526_v16 = vand.u32 4294901760, %v525_v38 }
  0x33   : > { %1798 = vmatprep.mubr.f32.mxu1 %v2214_v31  ;;  %1851 = vmatprep.subr.mxu1 %v2026_v10 }
  0x34   : > { %1763 = vmatmul.mubr.f32.gmra.mxu0 %v486_v13  ;;  %1852 = vmatpush3.msra.mxu1 %v2026_v10  ;;  %v2489_v13 = vld [vmem:[%s2633_s2] ss:$0 sm:$0xff] }
  0x35   : > { %1765 = vmatprep.mubr.f32.mxu0 %v496_v29  ;;  %1817 = vmatprep.subr.mxu0 %v2048_v17 }
  0x36   : > { %1799 = vmatmul.mubr.f32.gmra.mxu1 %v2216_v33  ;;  %1818 = vmatpush3.msra.mxu0 %v2048_v17  ;;  %v2643_v17 = vand.u32 4294901760, %v2162_v26 }
  0x37   : > { %1801 = vmatprep.mubr.f32.mxu1 %v2225_v43  ;;  %1853 = vmatprep.subr.mxu1 %v2028_v11 }
  0x38   : > { %1766 = vmatmul.mubr.f32.gmra.mxu0 %v506_v37  ;;  %1854 = vmatpush3.msra.mxu1 %v2028_v11 }
  0x39   : > { %1768 = vmatprep.mubr.f32.mxu0 %v516_v14  ;;  %1879 = vmatprep.subr.mxu0 %v2052_v18 }
  0x3a   : > { %1802 = vmatmul.mubr.f32.gmra.mxu1 %v2235_v47  ;;  %1915 = vmatprep.subr.mxu1 %v2009_v3 }
  0x3b   : > { %1804 = vmatprep.mubr.f32.mxu1 %v2247_v2 }
  0x3c   : > { %1769 = vmatmul.mubr.f32.gmra.mxu0 %v526_v16 }
  0x3d   : > { %1819 = vmatprep.mubr.f32.mxu0 %v2114_v49 }
  0x3e   : > { %1805 = vmatmul.mubr.f32.gmra.mxu1 %v2269_v56 }
  0x3f   : > { %1855 = vmatprep.mubr.f32.mxu1 %v374_v58 }
  0x40   : > { %1820 = vmatmul.mubr.f32.vlgmr.msra.gmra.mxu0 %v2124_v54 }
  0x41   : > { %1880 = vmatpush3.msra.mxu0 %v2052_v18  ;;  %1822 = vmatprep.mubr.f32.mxu0 %v2133_v59  ;;  %v2645_v18 = vand.u32 4294901760, %v2207_v46 }
  0x42   : > { %1856 = vmatmul.mubr.f32.vlgmr.msra.gmra.mxu1 %v384_v62  ;;  %1881 = vmatprep.subr.mxu0 %v2055_v19 }
  0x43   : > { %1916 = vmatpush3.msra.mxu1 %v2009_v3  ;;  %1858 = vmatprep.mubr.f32.mxu1 %v394_v6  ;;  %v2642_v3 = vand.u32 4294901760, %v2155_v8 }
  0x44   : > { %1823 = vmatmul.mubr.f32.gmra.mxu0 %v2136_v60  ;;  %1917 = vmatprep.subr.mxu1 %v2011_v4 }
  0x45   : > { %1825 = vmatprep.mubr.f32.mxu0 %v2143_v63  ;;  %1882 = vmatpush3.msra.mxu0 %v2055_v19  ;;  %v2647_v19 = vand.u32 4294901760, %v2230_v52 }
  0x46   : > { %1859 = vmatmul.mubr.f32.gmra.mxu1 %v404_v7  ;;  %1883 = vmatprep.subr.mxu0 %v2058_v20 }
  0x47   : > { %1861 = vmatprep.mubr.f32.mxu1 %v414_v25  ;;  %1918 = vmatpush3.msra.mxu1 %v2011_v4  ;;  %v2644_v4 = vand.u32 4294901760, %v2179_v36 }
  0x48   : > { %1826 = vmatmul.mubr.f32.gmra.mxu0 %v2155_v8  ;;  %1919 = vmatprep.subr.mxu1 %v2013_v5 }
  0x49   : > { %1828 = vmatprep.mubr.f32.mxu0 %v2162_v26  ;;  %1884 = vmatpush3.msra.mxu0 %v2058_v20 }
  0x4a   : > { %1862 = vmatmul.mubr.f32.gmra.mxu1 %v2642_v3  ;;  %1885 = vmatprep.subr.mxu0 %v2062_v21 }
  0x4b   : > { %1864 = vmatprep.mubr.f32.mxu1 %v2643_v17  ;;  %1920 = vmatpush3.msra.mxu1 %v2013_v5  ;;  %v2646_v5 = vand.u32 4294901760, %v2223_v42 }
  0x4c   : > { %1829 = vmatmul.mubr.f32.gmra.mxu0 %v2179_v36  ;;  %1921 = vmatprep.subr.mxu1 %v2024_v9 }
  0x4d   : > { %1831 = vmatprep.mubr.f32.mxu0 %v2207_v46  ;;  %1886 = vmatpush3.msra.mxu0 %v2062_v21 }
  0x4e   : > { %1865 = vmatmul.mubr.f32.gmra.mxu1 %v2644_v4  ;;  %1887 = vmatprep.subr.mxu0 %v2067_v22 }
  0x4f   : > { %1867 = vmatprep.mubr.f32.mxu1 %v2645_v18  ;;  %1922 = vmatpush3.msra.mxu1 %v2024_v9 }
  0x50   : > { %1832 = vmatmul.mubr.f32.gmra.mxu0 %v2223_v42  ;;  %1923 = vmatprep.subr.mxu1 %v2026_v10 }
  0x51   : > { %1834 = vmatprep.mubr.f32.mxu0 %v2230_v52  ;;  %1888 = vmatpush3.msra.mxu0 %v2067_v22 }
  0x52   : > { %1868 = vmatmul.mubr.f32.gmra.mxu1 %v2646_v5  ;;  %1889 = vmatprep.subr.mxu0 %v2070_v23 }
  0x53   : > { %1870 = vmatprep.mubr.f32.mxu1 %v2647_v19  ;;  %1924 = vmatpush3.msra.mxu1 %v2026_v10 }
  0x54   : > { %1835 = vmatmul.mubr.f32.gmra.mxu0 %v2233_v41  ;;  %1925 = vmatprep.subr.mxu1 %v2028_v11 }
  0x55   : > { %1837 = vmatprep.mubr.f32.mxu0 %v2245_v1  ;;  %1890 = vmatpush3.msra.mxu0 %v2070_v23 }
  0x56   : > { %1871 = vmatmul.mubr.f32.gmra.mxu1 %v484_v35 }
  0x57   : > { %1873 = vmatprep.mubr.f32.mxu1 %v494_v28  ;;  %1926 = vmatpush3.msra.mxu1 %v2028_v11 }
  0x58   : > { %1838 = vmatmul.mubr.f32.gmra.mxu0 %v2259_v32 }
  0x59   : > { %1840 = vmatprep.mubr.f32.mxu0 %v2267_v44 }
  0x5a   : > { %1874 = vmatmul.mubr.f32.gmra.mxu1 %v504_v48 }
  0x5b   : > { %1876 = vmatprep.mubr.f32.mxu1 %v514_v57 }
  0x5c   : > { %1841 = vmatmul.mubr.f32.gmra.mxu0 %v2281_v30 }
  0x5d   : > { %1891 = vmatprep.mubr.f32.mxu0 %v2100_v40 }
  0x5e   : > { %1877 = vmatmul.mubr.f32.gmra.mxu1 %v524_v34 }
  0x5f   : > { %1927 = vmatprep.mubr.f32.mxu1 %v2100_v40 }
  0x60   : > { %1892 = vmatmul.mubr.f32.vlgmr.msra.gmra.mxu0 %v2106_v45 }
  0x61   : > { %1894 = vmatprep.mubr.f32.mxu0 %v2116_v50 }
  0x62   : > { %1928 = vmatmul.mubr.f32.vlgmr.msra.gmra.mxu1 %v2106_v45 }
  0x63   : > { %1930 = vmatprep.mubr.f32.mxu1 %v2116_v50 }
  0x64   : > { %1895 = vmatmul.mubr.f32.gmra.mxu0 %v2118_v51 }
  0x65   : > { %1897 = vmatprep.mubr.f32.mxu0 %v2126_v55 }
  0x66   : > { %1931 = vmatmul.mubr.f32.gmra.mxu1 %v2118_v51 }
  0x67   : > { %1933 = vmatprep.mubr.f32.mxu1 %v2126_v55 }
  0x68   : > { %1898 = vmatmul.mubr.f32.gmra.mxu0 %v2138_v61 }
  0x69   : > { %1900 = vmatprep.mubr.f32.mxu0 %v2145_v0 }
  0x6a   : > { %1934 = vmatmul.mubr.f32.gmra.mxu1 %v2138_v61 }
  0x6b   : > { %1936 = vmatprep.mubr.f32.mxu1 %v2145_v0 }
  0x6c   : > { %1901 = vmatmul.mubr.f32.gmra.mxu0 %v2164_v27 }
  0x6d   : > { %1903 = vmatprep.mubr.f32.mxu0 %v2193_v53 }
  0x6e   : > { %1937 = vmatmul.mubr.f32.gmra.mxu1 %v2164_v27 }
  0x6f   : > { %1939 = vmatprep.mubr.f32.mxu1 %v2193_v53 }
  0x70   : > { %1904 = vmatmul.mubr.f32.gmra.mxu0 %v2209_v12 }
  0x71   : > { %1906 = vmatprep.mubr.f32.mxu0 %v2214_v31 }
  0x72   : > { %1940 = vmatmul.mubr.f32.gmra.mxu1 %v2209_v12 }
  0x73   : > { %1942 = vmatprep.mubr.f32.mxu1 %v2214_v31 }
  0x74   : > { %1907 = vmatmul.mubr.f32.gmra.mxu0 %v2216_v33 }
  0x75   : > { %1909 = vmatprep.mubr.f32.mxu0 %v2225_v43 }
  0x76   : > { %1943 = vmatmul.mubr.f32.gmra.mxu1 %v2216_v33 }
  0x77   : > { %1945 = vmatprep.mubr.f32.mxu1 %v2225_v43 }
  0x78   : > { %1910 = vmatmul.mubr.f32.gmra.mxu0 %v2235_v47 }
  0x79   : > { %1912 = vmatprep.mubr.f32.mxu0 %v2247_v2 }
  0x7a   : > { %1946 = vmatmul.mubr.f32.gmra.mxu1 %v2235_v47 }
  0x7b   : > { %1948 = vmatprep.mubr.f32.mxu1 %v2247_v2 }
  0x7c   : > { %1913 = vmatmul.mubr.f32.gmra.mxu0 %v2269_v56 }
  0x7e   : > { %1949 = vmatmul.mubr.f32.gmra.mxu1 %v2269_v56 }
  0xe0   : > { %v1749_v9 = vpop.f32.mrf.mxu0 }
  0xe1   : > { %v389_v37 = vadd.f32 %v1749_v9, %v2489_v13 }
  0xe2   : > { %v378_v10 = vpop.f32.mrf.mxu0  ;;  %v1785_v11 = vpop.f32.mrf.mxu1 }
  0xe3   : > { %v379_v16 = vadd.f32 %v2489_v13, %v378_v10  ;;  %v636_v4 = vadd.f32 %v1785_v11, %v389_v37 }
  0xe4   : > { %v1752_v20 = vpop.f32.mrf.mxu0  ;;  %v629_v21 = vpop.f32.mrf.mxu1 }
  0xe5   : > { %v409_v18 = vadd.f32 %v1752_v20, %v2489_v13 }
  0xe6   : > { %v398_v22 = vpop.f32.mrf.mxu0  ;;  %v2422_v23 = vpop.f32.mrf.mxu1 }
  0xe7   : > { %v399_v9 = vadd.f32 %v2489_v13, %v398_v22 }
  0xe8   : > { %v1755_v40 = vpop.f32.mrf.mxu0  ;;  %v2424_v45 = vpop.f32.mrf.mxu1 }
  0xea   : > { %v2426_v49 = vpop.f32.mrf.mxu0  ;;  %v2428_v50 = vpop.f32.mrf.mxu1 }
  0xeb   : > { %v419_v20 = vadd.f32 %v2489_v13, %v2426_v49 }
  0xec   : > { %v2430_v51 = vpop.f32.mrf.mxu0  ;;  %v2432_v54 = vpop.f32.mrf.mxu1 }
  0xee   : > { %v2434_v55 = vpop.f32.mrf.mxu0  ;;  %v2436_v58 = vpop.f32.mrf.mxu1 }
  0xf0   : > { %v2438_v59 = vpop.f32.mrf.mxu0  ;;  %v2440_v60 = vpop.f32.mrf.mxu1 }
  0xf2   : > { %v2442_v61 = vpop.f32.mrf.mxu0  ;;  %v2444_v62 = vpop.f32.mrf.mxu1 }
  0xf4   : > { %v2446_v63 = vpop.f32.mrf.mxu0  ;;  %v2448_v0 = vpop.f32.mrf.mxu1 }
  0xf6   : > { %v2450_v6 = vpop.f32.mrf.mxu0  ;;  %v2452_v7 = vpop.f32.mrf.mxu1 }
  0xf8   : > { %v2454_v8 = vpop.f32.mrf.mxu0  ;;  %v2456_v25 = vpop.f32.mrf.mxu1 }
  0xfa   : > { %v2458_v26 = vpop.f32.mrf.mxu0  ;;  %v2460_v27 = vpop.f32.mrf.mxu1 }
  0xfc   : > { %v2462_v32 = vpop.f32.mrf.mxu0  ;;  %v2464_v35 = vpop.f32.mrf.mxu1 }
  0xfe   : > { %v2466_v36 = vpop.f32.mrf.mxu0  ;;  %v2468_v52 = vpop.f32.mrf.mxu1 }
  0xff   : > { %2648 = vst [vmem:[#allocation2_spill] sm:$0xff] %v2466_v36  ;;  %2649 = vst [vmem:[#allocation3_spill] sm:$0xff] %v2468_v52 }
 0x100   : > { %v1821_v53 = vpop.f32.mrf.mxu0  ;;  %v2470_v46 = vpop.f32.mrf.mxu1 }
 0x101   : > { %2650 = vst [vmem:[#allocation4_spill] sm:$0xff] %v2470_v46  ;;  %v630_v46 = vadd.f32 %v629_v21, %v379_v16  ;;  %v811_v52 = vadd.f32 %v1821_v53, %v636_v4  ;;  %v642_v21 = vadd.f32 %v2424_v45, %v399_v9 }
 0x102   : > { %v803_v12 = vpop.f32.mrf.mxu0  ;;  %v1857_v31 = vpop.f32.mrf.mxu1 }
 0x103   : > { %v804_v11 = vadd.f32 %v803_v12, %v630_v46  ;;  %v996_v22 = vadd.f32 %v1857_v31, %v811_v52  ;;  %v654_v52 = vadd.f32 %v2432_v54, %v419_v20  ;;  %v439_v31 = vadd.f32 %v2489_v13, %v2434_v55  ;;  %v1457_v20 = vld [vmem:[%s2532_s12] sm:$0xff] }
 0x104   : > { %v1824_v33 = vpop.f32.mrf.mxu0  ;;  %v987_v42 = vpop.f32.mrf.mxu1 }
 0x105   : > { %v988_v12 = vadd.f32 %v987_v42, %v804_v11  ;;  %v469_v42 = vadd.f32 %v2438_v59, %v2489_v13 }
 0x106   : > { %v817_v43 = vpop.f32.mrf.mxu0  ;;  %v1860_v41 = vpop.f32.mrf.mxu1 }
 0x107   : > { %v818_v16 = vadd.f32 %v817_v43, %v642_v21 }
 0x108   : > { %v1827_v47 = vpop.f32.mrf.mxu0  ;;  %v1003_v57 = vpop.f32.mrf.mxu1 }
 0x109   : > { %v1004_v21 = vadd.f32 %v1003_v57, %v818_v16 }
 0x10a   : > { %v831_v1 = vpop.f32.mrf.mxu0  ;;  %v2472_v2 = vpop.f32.mrf.mxu1 }
 0x10b   : > { %v832_v43 = vadd.f32 %v831_v1, %v654_v52  ;;  %v1460_v1 = vld [vmem:[%s2532_s12 + $0x18] sm:$0xff] }
 0x10c   : > { %v2474_v30 = vpop.f32.mrf.mxu0  ;;  %v2476_v28 = vpop.f32.mrf.mxu1 }
 0x10e   : > { %v2478_v44 = vpop.f32.mrf.mxu0  ;;  %v2480_v56 = vpop.f32.mrf.mxu1 }
 0x110   : > { %v2482_v48 = vpop.f32.mrf.mxu0  ;;  %v2484_v24 = vpop.f32.mrf.mxu1 }
 0x112   : > { %v2491_v39 = vpop.f32.mrf.mxu0  ;;  %v2493_v34 = vpop.f32.mrf.mxu1 }
 0x114   : > { %v2495_v29 = vpop.f32.mrf.mxu0  ;;  %v2497_v15 = vpop.f32.mrf.mxu1 }
 0x116   : > { %v2500_v38 = vpop.f32.mrf.mxu0  ;;  %v2502_v14 = vpop.f32.mrf.mxu1 }
 0x117   : > { %2651 = vst [vmem:[#allocation5_spill] sm:$0xff] %v2502_v14  ;;  %v429_v14 = vadd.f32 %v1755_v40, %v2489_v13  ;;  %v449_v40 = vadd.f32 %v2430_v51, %v2489_v13 }
 0x118   : > { %v2505_v3 = vpop.f32.mrf.mxu0  ;;  %v2507_v17 = vpop.f32.mrf.mxu1 }
 0x119   : > { %2652 = vst [vmem:[#allocation6_spill] sm:$0xff] %v2507_v17  ;;  %v648_v17 = vadd.f32 %v2422_v23, %v409_v18  ;;  %v660_v23 = vadd.f32 %v2428_v50, %v429_v14  ;;  %v1458_v18 = vld [vmem:[%s2532_s12 + $0x8] sm:$0xff]  ;;  %v672_v9 = vadd.f32 %v2436_v58, %v449_v40 }
 0x11a   : > { %v2510_v5 = vpop.f32.mrf.mxu0  ;;  %v2512_v19 = vpop.f32.mrf.mxu1 }
 0x11b   : > { %2653 = vst [vmem:[#allocation7_spill] sm:$0xff] %v2510_v5  ;;  %v825_v53 = vadd.f32 %v1824_v33, %v648_v17  ;;  %v839_v33 = vadd.f32 %v1827_v47, %v660_v23  ;;  %v666_v23 = vadd.f32 %v2440_v60, %v439_v31  ;;  %v853_v58 = vadd.f32 %v2474_v30, %v672_v9  ;;  %v1459_v31 = vld [vmem:[%s2532_s12 + $0x10] sm:$0xff] }
 0x11c   : > { %v2516_v36 = vpop.f32.mrf.mxu0  ;;  %v2518_v10 = vpop.f32.mrf.mxu1  ;;  %v1020_v30 = vadd.f32 %v2476_v28, %v832_v43 }
 0x11d   : > { %v1012_v50 = vadd.f32 %v1860_v41, %v825_v53  ;;  %v459_v41 = vadd.f32 %v2489_v13, %v2442_v61  ;;  %v1028_v53 = vadd.f32 %v2472_v2, %v839_v33  ;;  %v684_v61 = vadd.f32 %v2444_v62, %v469_v42 }
 0x11e   : > { %v2523_v37 = vpop.f32.mrf.mxu0  ;;  %v2525_v5 = vpop.f32.mrf.mxu1  ;;  %v489_v2 = vadd.f32 %v2446_v63, %v2489_v13  ;;  %v846_v16 = vadd.f32 %v2478_v44, %v666_v23  ;;  %v479_v62 = vadd.f32 %v2489_v13, %v2450_v6  ;;  %v1044_v63 = vadd.f32 %v2480_v56, %v853_v58  ;;  %v1464_v58 = vld [vmem:[%s2532_s12 + $0x38] sm:$0xff] }
 0x11f   : > { %v867_v28 = vadd.f32 %v2482_v48, %v684_v61 }
 0x120   : > { %v1893_v49 = vpop.f32.mrf.mxu0  ;;  %v2537_v46 = vpop.f32.mrf.mxu1  ;;  %v1036_v6 = vadd.f32 %v2484_v24, %v846_v16 }
 0x121   : > { %v1203_v45 = vadd.f32 %v1893_v49, %v996_v22 }
 0x122   : > { %v1196_v17 = vpop.f32.mrf.mxu0  ;;  %v1929_v4 = vpop.f32.mrf.mxu1 }
 0x123   : > { %v1197_v14 = vadd.f32 %v1196_v17, %v988_v12  ;;  %v1370_v51 = vadd.f32 %v1929_v4, %v1203_v45 }
 0x124   : > { %v1896_v11 = vpop.f32.mrf.mxu0  ;;  %v1363_v54 = vpop.f32.mrf.mxu1 }
 0x125   : > { %v1474_v55 = vadd.f32 %v1458_v18, %v1370_v51  ;;  %v1215_v47 = vadd.f32 %v1896_v11, %v1012_v50  ;;  %v1364_v22 = vadd.f32 %v1363_v54, %v1197_v14  ;;  %v678_v50 = vadd.f32 %v2448_v0, %v459_v41  ;;  %v1462_v51 = vld [vmem:[%s2532_s12 + $0x28] sm:$0xff] }
 0x126   : > { %v1208_v59 = vpop.f32.mrf.mxu0  ;;  %v1932_v57 = vpop.f32.mrf.mxu1  ;;  %v696_v54 = vadd.f32 %v2452_v7, %v489_v2  ;;  %v509_v0 = vadd.f32 %v2454_v8, %v2489_v13  ;;  %v690_v41 = vadd.f32 %v2456_v25, %v479_v62  ;;  %v499_v7 = vadd.f32 %v2489_v13, %v2458_v26 }
 0x127   : > { %v1490_v40 = vmax.f32 %v1474_v55, 0.0  ;;  %v1473_v49 = vadd.f32 %v1457_v20, %v1364_v22  ;;  %v1209_v60 = vadd.f32 %v1208_v59, %v1004_v21  ;;  %v1382_v12 = vadd.f32 %v1932_v57, %v1215_v47  ;;  %v1461_v21 = vld [vmem:[%s2532_s12 + $0x20] sm:$0xff] }
 0x128   : > { %v1899_v45 = vpop.f32.mrf.mxu0  ;;  %v1375_v52 = vpop.f32.mrf.mxu1  ;;  %v860_v56 = vadd.f32 %v2491_v39, %v678_v50  ;;  %v1060_v8 = vadd.f32 %v2493_v34, %v867_v28  ;;  %v881_v24 = vadd.f32 %v2495_v29, %v696_v54  ;;  %v529_v25 = vadd.f32 %v2462_v32, %v2489_v13  ;;  %v2655_v32 = vld [vmem:[#allocation5_spill] sm:$0xff] }
 0x129   : > { %1506 = vst [vmem:[%s2556_s16 + $0x8] sm:$0xff] %v1490_v40  ;;  %v1489_v33 = vmax.f32 %v1473_v49, 0.0  ;;  %v1476_v17 = vadd.f32 %v1460_v1, %v1382_v12  ;;  %v1227_v4 = vadd.f32 %v1899_v45, %v1028_v53  ;;  %v1376_v18 = vadd.f32 %v1375_v52, %v1209_v60  ;;  %v1463_v12 = vld [vmem:[%s2532_s12 + $0x30] sm:$0xff] }
 0x12a   : > { %v1220_v44 = vpop.f32.mrf.mxu0  ;;  %v1935_v14 = vpop.f32.mrf.mxu1  ;;  %v708_v49 = vadd.f32 %v2460_v27, %v509_v0  ;;  %v1052_v26 = vadd.f32 %v2497_v15, %v860_v56  ;;  %v874_v34 = vadd.f32 %v2500_v38, %v690_v41  ;;  %v702_v45 = vadd.f32 %v2464_v35, %v499_v7  ;;  %v2654_v27 = vld [vmem:[#allocation2_spill] sm:$0xff]  ;;  %v2659_v0 = vld [vmem:[#allocation4_spill] sm:$0xff] }
 0x12b   : > { %1505 = vst [vmem:[%s2556_s16] sm:$0xff] %v1489_v33  ;;  %v1492_v9 = vmax.f32 %v1476_v17, 0.0  ;;  %v1475_v42 = vadd.f32 %v1459_v31, %v1376_v18  ;;  %v1221_v43 = vadd.f32 %v1220_v44, %v1020_v30  ;;  %v1394_v11 = vadd.f32 %v1935_v14, %v1227_v4  ;;  %v1466_v17 = vld [vmem:[%s2532_s12 + $0x48] sm:$0xff]  ;;  %v2657_v35 = vld [vmem:[#allocation6_spill] sm:$0xff] }
 0x12c   : > { %v1902_v48 = vpop.f32.mrf.mxu0  ;;  %v1387_v20 = vpop.f32.mrf.mxu1  ;;  %v519_v52 = vadd.f32 %v2489_v13, %v2654_v27  ;;  %v1076_v15 = vadd.f32 %v2655_v32, %v881_v24  ;;  %v895_v38 = vadd.f32 %v2505_v3, %v708_v49  ;;  %v1068_v44 = vadd.f32 %v2657_v35, %v874_v34  ;;  %v2658_v13 = vld [vmem:[#allocation7_spill] sm:$0xff]  ;;  %v1472_v27 = vld [vmem:[%s2532_s12 + $0x78] sm:$0xff] }
 0x12d   : > { %1508 = vst [vmem:[%s2556_s16 + $0x18] sm:$0xff] %v1492_v9  ;;  %v1491_v55 = vmax.f32 %v1475_v42, 0.0  ;;  %v1478_v47 = vadd.f32 %v1462_v51, %v1394_v11  ;;  %v1239_v22 = vadd.f32 %v1902_v48, %v1044_v63  ;;  %v1388_v23 = vadd.f32 %v1387_v20, %v1221_v43  ;;  %v2656_v63 = vld [vmem:[#allocation3_spill] sm:$0xff]  ;;  %v1465_v42 = vld [vmem:[%s2532_s12 + $0x40] sm:$0xff] }
 0x12e   : > { %v1232_v39 = vpop.f32.mrf.mxu0  ;;  %v1938_v53 = vpop.f32.mrf.mxu1  ;;  %v720_v28 = vadd.f32 %v2656_v63, %v529_v25  ;;  %v888_v14 = vadd.f32 %v2658_v13, %v702_v45  ;;  %v1092_v56 = vadd.f32 %v2512_v19, %v895_v38  ;;  %v1470_v49 = vld [vmem:[%s2532_s12 + $0x68] sm:$0xff] }
 0x12f   : > { %1507 = vst [vmem:[%s2556_s16 + $0x10] sm:$0xff] %v1491_v55  ;;  %v1494_v59 = vmax.f32 %v1478_v47, 0.0  ;;  %v1477_v57 = vadd.f32 %v1461_v21, %v1388_v23  ;;  %v1233_v1 = vadd.f32 %v1232_v39, %v1036_v6  ;;  %v1406_v40 = vadd.f32 %v1938_v53, %v1239_v22  ;;  %v1468_v55 = vld [vmem:[%s2532_s12 + $0x58] sm:$0xff]  ;;  %v1467_v53 = vld [vmem:[%s2532_s12 + $0x50] sm:$0xff] }
 0x130   : > { %v1905_v29 = vpop.f32.mrf.mxu0  ;;  %v1399_v60 = vpop.f32.mrf.mxu1  ;;  %v714_v6 = vadd.f32 %v2659_v0, %v519_v52  ;;  %v909_v48 = vadd.f32 %v2516_v36, %v720_v28  ;;  %v1084_v7 = vadd.f32 %v2518_v10, %v888_v14 }
 0x131   : > { %1510 = vst [vmem:[%s2556_s16 + $0x28] sm:$0xff] %v1494_v59  ;;  %v1493_v61 = vmax.f32 %v1477_v57, 0.0  ;;  %v1480_v2 = vadd.f32 %v1464_v58, %v1406_v40  ;;  %v1251_v30 = vadd.f32 %v1905_v29, %v1060_v8  ;;  %v1400_v16 = vadd.f32 %v1399_v60, %v1233_v1 }
 0x132   : > { %v1244_v31 = vpop.f32.mrf.mxu0  ;;  %v1941_v33 = vpop.f32.mrf.mxu1  ;;  %v902_v8 = vadd.f32 %v2523_v37, %v714_v6  ;;  %v1108_v57 = vadd.f32 %v2525_v5, %v909_v48 }
 0x133   : > { %1509 = vst [vmem:[%s2556_s16 + $0x20] sm:$0xff] %v1493_v61  ;;  %v1496_v4 = vmax.f32 %v1480_v2, 0.0  ;;  %v1479_v18 = vadd.f32 %v1463_v12, %v1400_v16  ;;  %v1245_v50 = vadd.f32 %v1244_v31, %v1052_v26  ;;  %v1418_v62 = vadd.f32 %v1941_v33, %v1251_v30  ;;  %v1469_v12 = vld [vmem:[%s2532_s12 + $0x60] sm:$0xff]  ;;  %v1471_v31 = vld [vmem:[%s2532_s12 + $0x70] sm:$0xff] }
 0x134   : > { %v1908_v51 = vpop.f32.mrf.mxu0  ;;  %v1411_v9 = vpop.f32.mrf.mxu1  ;;  %v1100_v34 = vadd.f32 %v2537_v46, %v902_v8 }
 0x135   : > { %1512 = vst [vmem:[%s2556_s16 + $0x38] sm:$0xff] %v1496_v4  ;;  %v1495_v3 = vmax.f32 %v1479_v18, 0.0  ;;  %v1482_v43 = vadd.f32 %v1466_v17, %v1418_v62  ;;  %v1263_v11 = vadd.f32 %v1908_v51, %v1076_v15  ;;  %v1412_v54 = vadd.f32 %v1411_v9, %v1245_v50 }
 0x136   : > { %v1256_v20 = vpop.f32.mrf.mxu0  ;;  %v1944_v21 = vpop.f32.mrf.mxu1 }
 0x137   : > { %1511 = vst [vmem:[%s2556_s16 + $0x30] sm:$0xff] %v1495_v3  ;;  %v1498_v47 = vmax.f32 %v1482_v43, 0.0  ;;  %v1481_v22 = vadd.f32 %v1465_v42, %v1412_v54  ;;  %v1257_v23 = vadd.f32 %v1256_v20, %v1068_v44  ;;  %v1430_v41 = vadd.f32 %v1944_v21, %v1263_v11 }
 0x138   : > { %v1911_v24 = vpop.f32.mrf.mxu0  ;;  %v1423_v39 = vpop.f32.mrf.mxu1 }
 0x139   : > { %1514 = vst [vmem:[%s2556_s16 + $0x48] sm:$0xff] %v1498_v47  ;;  %v1497_v19 = vmax.f32 %v1481_v22, 0.0  ;;  %v1484_v36 = vadd.f32 %v1468_v55, %v1430_v41  ;;  %v1275_v58 = vadd.f32 %v1911_v24, %v1092_v56  ;;  %v1424_v59 = vadd.f32 %v1423_v39, %v1257_v23 }
 0x13a   : > { %v1268_v1 = vpop.f32.mrf.mxu0  ;;  %v1947_v40 = vpop.f32.mrf.mxu1 }
 0x13b   : > { %1513 = vst [vmem:[%s2556_s16 + $0x40] sm:$0xff] %v1497_v19  ;;  %v1500_v10 = vmax.f32 %v1484_v36, 0.0  ;;  %v1483_v37 = vadd.f32 %v1467_v53, %v1424_v59  ;;  %v1269_v25 = vadd.f32 %v1268_v1, %v1084_v7  ;;  %v1442_v26 = vadd.f32 %v1947_v40, %v1275_v58 }
 0x13c   : > { %v1914_v29 = vpop.f32.mrf.mxu0  ;;  %v1435_v60 = vpop.f32.mrf.mxu1 }
 0x13d   : > { %1516 = vst [vmem:[%s2556_s16 + $0x58] sm:$0xff] %v1500_v10  ;;  %v1499_v61 = vmax.f32 %v1483_v37, 0.0  ;;  %v1486_v5 = vadd.f32 %v1470_v49, %v1442_v26  ;;  %v1287_v2 = vadd.f32 %v1914_v29, %v1108_v57  ;;  %v1436_v30 = vadd.f32 %v1435_v60, %v1269_v25 }
 0x13e   : > { %v1280_v16 = vpop.f32.mrf.mxu0  ;;  %v1950_v45 = vpop.f32.mrf.mxu1 }
 0x13f   : > { %1515 = vst [vmem:[%s2556_s16 + $0x50] sm:$0xff] %v1499_v61  ;;  %v1502_v52 = vmax.f32 %v1486_v5, 0.0  ;;  %v1485_v32 = vadd.f32 %v1469_v12, %v1436_v30  ;;  %v1281_v46 = vadd.f32 %v1280_v16, %v1100_v34  ;;  %v1454_v15 = vadd.f32 %v1950_v45, %v1287_v2 }
 0x140   : > { %v1447_v38 = vpop.f32.mrf.mxu1 }
 0x141   : > { %1518 = vst [vmem:[%s2556_s16 + $0x68] sm:$0xff] %v1502_v52  ;;  %v1501_v33 = vmax.f32 %v1485_v32, 0.0  ;;  %v1488_v17 = vadd.f32 %v1472_v27, %v1454_v15  ;;  %v1448_v4 = vadd.f32 %v1447_v38, %v1281_v46 }
 0x143   : > { %1517 = vst [vmem:[%s2556_s16 + $0x60] sm:$0xff] %v1501_v33  ;;  %v1504_v18 = vmax.f32 %v1488_v17, 0.0  ;;  %v1487_v50 = vadd.f32 %v1471_v31, %v1448_v4 }
 0x145   : > { %1520 = vst [vmem:[%s2556_s16 + $0x78] sm:$0xff] %v1504_v18  ;;  %v1503_v62 = vmax.f32 %v1487_v50, 0.0 }
 0x147   : > { %1519 = vst [vmem:[%s2556_s16 + $0x70] sm:$0xff] %v1503_v62 }
 0x148 PF: > { %s14_s15 = sadd.s32 1, %s1965_s15  }
 0x149   : > { %p11_p4 = scmp.ge.s32.totalorder %s14_s15, 4  }
 0x14b   :  { %13 = sbr.rel (!%p11_p4) target bundleno = 1 (0x1), region = 69 }

</bundles_post_ra>
